<compile_context>
chip_gen: v6e
topology: v6e:2x2x1
jax: 0.10.0
libtpu: 0.0.40
codegen_flags: <defaults>
</compile_context>

<pallas_src>
import math

import jax
import jax.numpy as jnp
from jax.experimental import pallas as pl
from jax.experimental.pallas import tpu as pltpu

ACTION_BOUND = 2.0

# --- static row offsets inside the packed weight slab (8-row aligned) --------
ROW_W1, ROW_B1 = 0, 8          # w1: (3, 64)   b1: (1, 64)
ROW_W2, ROW_B2 = 16, 80        # w2: (64, 32)  b2: (1, 32)
ROW_W3, ROW_B3 = 88, 120       # w3: (32, 16)  b3: (1, 16)
ROW_WH, ROW_BH = 128, 144      # wh: (16, 2)   bh: (1, 2)   (mean|std fused)
SLAB_ROWS, SLAB_COLS = 152, 128


def _round_up(n, m):
    return ((n + m - 1) // m) * m


def pack_params(p):
    """Pack all weights/biases into one zero-padded (152, 128) f32 slab."""
    slab = jnp.zeros((SLAB_ROWS, SLAB_COLS), jnp.float32)
    slab = slab.at[ROW_W1:ROW_W1 + 3, 0:64].set(p["w1"])
    slab = slab.at[ROW_B1:ROW_B1 + 1, 0:64].set(p["b1"])
    slab = slab.at[ROW_W2:ROW_W2 + 64, 0:32].set(p["w2"])
    slab = slab.at[ROW_B2:ROW_B2 + 1, 0:32].set(p["b2"])
    slab = slab.at[ROW_W3:ROW_W3 + 32, 0:16].set(p["w3"])
    slab = slab.at[ROW_B3:ROW_B3 + 1, 0:16].set(p["b3"])
    wh = jnp.concatenate([p["wm"], p["ws"]], axis=1)   # (16, 2)
    bh = jnp.concatenate([p["bm"], p["bs"]], axis=1)   # (1, 2)
    slab = slab.at[ROW_WH:ROW_WH + 16, 0:2].set(wh)
    slab = slab.at[ROW_BH:ROW_BH + 1, 0:2].set(bh)
    return slab


def actor_kernel(x_ref, slab_ref, out_ref):
    x = x_ref[...]                                      # (TB, 3) f32

    # ---- layer 1: (TB,3)@(3,64) done as 3 broadcast FMAs on the VPU --------
    w1r0 = slab_ref[ROW_W1 + 0:ROW_W1 + 1, 0:64]        # (1, 64)
    w1r1 = slab_ref[ROW_W1 + 1:ROW_W1 + 2, 0:64]
    w1r2 = slab_ref[ROW_W1 + 2:ROW_W1 + 3, 0:64]
    b1 = slab_ref[ROW_B1:ROW_B1 + 1, 0:64]
    h1 = (x[:, 0:1] * w1r0 + x[:, 1:2] * w1r1 + x[:, 2:3] * w1r2 + b1)
    h1 = jnp.maximum(h1, 0.0)                           # (TB, 64)

    # ---- layer 2: (TB,64)@(64,32) ------------------------------------------
    w2 = slab_ref[ROW_W2:ROW_W2 + 64, 0:32]
    b2 = slab_ref[ROW_B2:ROW_B2 + 1, 0:32]
    h2 = jnp.maximum(
        jnp.dot(h1, w2, preferred_element_type=jnp.float32) + b2, 0.0)

    # ---- layer 3: (TB,32)@(32,16) ------------------------------------------
    w3 = slab_ref[ROW_W3:ROW_W3 + 32, 0:16]
    b3 = slab_ref[ROW_B3:ROW_B3 + 1, 0:16]
    h3 = jnp.maximum(
        jnp.dot(h2, w3, preferred_element_type=jnp.float32) + b3, 0.0)

    # ---- fused heads: one (16,2) matmul, col 0 = mean, col 1 = std ---------
    wh = slab_ref[ROW_WH:ROW_WH + 16, 0:2]
    bh = slab_ref[ROW_BH:ROW_BH + 1, 0:2]
    head = jnp.dot(h3, wh, preferred_element_type=jnp.float32) + bh  # (TB, 2)

    tanh_part = jnp.tanh(head) * ACTION_BOUND
    sp_part = jnp.maximum(head, 0.0) + jnp.log1p(jnp.exp(-jnp.abs(head)))
    col = jax.lax.broadcasted_iota(jnp.int32, head.shape, 1)
    out_ref[...] = jnp.where(col == 0, tanh_part, sp_part).astype(out_ref.dtype)


def actor_net_forward(x, params, *, tb=256):
    """x: (B, 3) float32. Returns (mean, std), each (B, 1) float32."""
    B = x.shape[0]
    TB = _round_up(min(tb, _round_up(B, 8)), 8)
    Bp = _round_up(B, TB)
    if Bp != B:
        x = jnp.pad(x, ((0, Bp - B), (0, 0)))

    slab = pack_params(params)

    out = pl.pallas_call(
        actor_kernel,
        out_shape=jax.ShapeDtypeStruct((Bp, 2), jnp.float32),
        grid=(pl.cdiv(Bp, TB),),
        in_specs=[
            pl.BlockSpec((TB, 3), lambda i: (i, 0)),
            pl.BlockSpec((SLAB_ROWS, SLAB_COLS), lambda i: (0, 0)),
        ],
        out_specs=pl.BlockSpec((TB, 2), lambda i: (i, 0)),
        compiler_params=pltpu.CompilerParams(
            dimension_semantics=("parallel",)),
    )(x, slab)

    return out[:B, 0:1], out[:B, 1:2]


def init_params(key):
    """PyTorch-style uniform(-1/sqrt(fan_in), 1/sqrt(fan_in)) init.

    Weights stored as (in_features, out_features); biases as (1, out)."""
    dims = [("w1", "b1", 3, 64),
            ("w2", "b2", 64, 32),
            ("w3", "b3", 32, 16),
            ("wm", "bm", 16, 1),
            ("ws", "bs", 16, 1)]
    params = {}
    keys = jax.random.split(key, 2 * len(dims))
    for i, (wn, bn, fin, fout) in enumerate(dims):
        bound = 1.0 / math.sqrt(fin)
        params[wn] = jax.random.uniform(
            keys[2 * i], (fin, fout), jnp.float32, -bound, bound)
        params[bn] = jax.random.uniform(
            keys[2 * i + 1], (1, fout), jnp.float32, -bound, bound)
    return params


def reference_forward(x, p):
    h = jnp.maximum(x @ p["w1"] + p["b1"], 0.0)
    h = jnp.maximum(h @ p["w2"] + p["b2"], 0.0)
    h = jnp.maximum(h @ p["w3"] + p["b3"], 0.0)
    mean = jnp.tanh(h @ p["wm"] + p["bm"]) * ACTION_BOUND
    std = jax.nn.softplus(h @ p["ws"] + p["bs"])
    return mean, std


if __name__ == "__main__":
    key = jax.random.PRNGKey(0)
    k_x, k_p = jax.random.split(key)

    B = 8  # small batch of Pendulum observations (cos θ, sin θ, θ_dot)
    x = jax.random.normal(k_x, (B, 3), jnp.float32)
    params = init_params(k_p)

    mean, std = actor_net_forward(x, params)
    mean, std = jax.block_until_ready((mean, std))

    mean_ref, std_ref = reference_forward(x, params)
    assert mean.shape == (B, 1) and std.shape == (B, 1)
    assert jnp.allclose(mean, mean_ref, atol=1e-5, rtol=1e-5)
    assert jnp.allclose(std, std_ref, atol=1e-5, rtol=1e-5)

    print("KERNEL_OK")
</pallas_src>

<mosaic_0001>
module attributes {stable_mosaic.version = 11 : i64} {
  func.func @actor_kernel(%arg0: i32, %arg1: memref<8x3xf32, #tpu.memory_space<vmem>>, %arg2: memref<152x128xf32, #tpu.memory_space<vmem>>, %arg3: memref<8x2xf32, #tpu.memory_space<vmem>>) attributes {dimension_semantics = [#tpu.dimension_semantics<parallel>], iteration_bounds = array<i64: 1>, scalar_prefetch = 0 : i64, scratch_operands = 0 : i64, tpu.core_type = #tpu.core_type<tc>, window_params = [{transform_indices = @transform_0, window_bounds = array<i64: 8, 3>}, {pipeline_mode = #tpu.pipeline_mode<synchronous>, transform_indices = @transform_1, window_bounds = array<i64: 152, 128>}, {transform_indices = @transform_2, window_bounds = array<i64: 8, 2>}]} {
    %c0 = arith.constant 0 : index
    %c0_0 = arith.constant 0 : index
    %0 = vector.load %arg1[%c0, %c0_0] : memref<8x3xf32, #tpu.memory_space<vmem>>, vector<8x3xf32>
    %c0_1 = arith.constant 0 : index
    %c0_2 = arith.constant 0 : index
    %1 = vector.load %arg2[%c0_1, %c0_2] : memref<152x128xf32, #tpu.memory_space<vmem>>, vector<1x64xf32>
    %c1 = arith.constant 1 : index
    %c0_3 = arith.constant 0 : index
    %2 = vector.load %arg2[%c1, %c0_3] : memref<152x128xf32, #tpu.memory_space<vmem>>, vector<1x64xf32>
    %c2 = arith.constant 2 : index
    %c0_4 = arith.constant 0 : index
    %3 = vector.load %arg2[%c2, %c0_4] : memref<152x128xf32, #tpu.memory_space<vmem>>, vector<1x64xf32>
    %c8 = arith.constant 8 : index
    %c0_5 = arith.constant 0 : index
    %4 = vector.load %arg2[%c8, %c0_5] : memref<152x128xf32, #tpu.memory_space<vmem>>, vector<1x64xf32>
    %5 = vector.extract_strided_slice %0 {offsets = [0, 0], sizes = [8, 1], strides = [1, 1]} : vector<8x3xf32> to vector<8x1xf32>
    %6 = vector.broadcast %5 : vector<8x1xf32> to vector<8x64xf32>
    %7 = vector.broadcast %1 : vector<1x64xf32> to vector<8x64xf32>
    %8 = arith.mulf %6, %7 : vector<8x64xf32>
    %9 = vector.extract_strided_slice %0 {offsets = [0, 1], sizes = [8, 1], strides = [1, 1]} : vector<8x3xf32> to vector<8x1xf32>
    %10 = vector.broadcast %9 : vector<8x1xf32> to vector<8x64xf32>
    %11 = vector.broadcast %2 : vector<1x64xf32> to vector<8x64xf32>
    %12 = arith.mulf %10, %11 : vector<8x64xf32>
    %13 = arith.addf %8, %12 : vector<8x64xf32>
    %14 = vector.extract_strided_slice %0 {offsets = [0, 2], sizes = [8, 1], strides = [1, 1]} : vector<8x3xf32> to vector<8x1xf32>
    %15 = vector.broadcast %14 : vector<8x1xf32> to vector<8x64xf32>
    %16 = vector.broadcast %3 : vector<1x64xf32> to vector<8x64xf32>
    %17 = arith.mulf %15, %16 : vector<8x64xf32>
    %18 = arith.addf %13, %17 : vector<8x64xf32>
    %19 = vector.broadcast %4 : vector<1x64xf32> to vector<8x64xf32>
    %20 = arith.addf %18, %19 : vector<8x64xf32>
    %cst = arith.constant 0.000000e+00 : f32
    %21 = vector.broadcast %cst : f32 to vector<8x64xf32>
    %22 = arith.maximumf %20, %21 : vector<8x64xf32>
    %c16 = arith.constant 16 : index
    %c0_6 = arith.constant 0 : index
    %23 = vector.load %arg2[%c16, %c0_6] : memref<152x128xf32, #tpu.memory_space<vmem>>, vector<64x32xf32>
    %c80 = arith.constant 80 : index
    %c0_7 = arith.constant 0 : index
    %24 = vector.load %arg2[%c80, %c0_7] : memref<152x128xf32, #tpu.memory_space<vmem>>, vector<1x32xf32>
    %cst_8 = arith.constant dense<0.000000e+00> : vector<8x32xf32>
    %25 = tpu.matmul %22, %23, %cst_8 {dimension_numbers = #tpu.dot_dimension_numbers<[1], [0], [0], [1], [0, 0, 1, 1], [], []>} : vector<8x64xf32>, vector<64x32xf32>, vector<8x32xf32> -> vector<8x32xf32>
    %26 = vector.broadcast %24 : vector<1x32xf32> to vector<8x32xf32>
    %27 = arith.addf %25, %26 : vector<8x32xf32>
    %cst_9 = arith.constant 0.000000e+00 : f32
    %28 = vector.broadcast %cst_9 : f32 to vector<8x32xf32>
    %29 = arith.maximumf %27, %28 : vector<8x32xf32>
    %c88 = arith.constant 88 : index
    %c0_10 = arith.constant 0 : index
    %30 = vector.load %arg2[%c88, %c0_10] : memref<152x128xf32, #tpu.memory_space<vmem>>, vector<32x16xf32>
    %c120 = arith.constant 120 : index
    %c0_11 = arith.constant 0 : index
    %31 = vector.load %arg2[%c120, %c0_11] : memref<152x128xf32, #tpu.memory_space<vmem>>, vector<1x16xf32>
    %cst_12 = arith.constant dense<0.000000e+00> : vector<8x16xf32>
    %32 = tpu.matmul %29, %30, %cst_12 {dimension_numbers = #tpu.dot_dimension_numbers<[1], [0], [0], [1], [0, 0, 1, 1], [], []>} : vector<8x32xf32>, vector<32x16xf32>, vector<8x16xf32> -> vector<8x16xf32>
    %33 = vector.broadcast %31 : vector<1x16xf32> to vector<8x16xf32>
    %34 = arith.addf %32, %33 : vector<8x16xf32>
    %cst_13 = arith.constant 0.000000e+00 : f32
    %35 = vector.broadcast %cst_13 : f32 to vector<8x16xf32>
    %36 = arith.maximumf %34, %35 : vector<8x16xf32>
    %c128 = arith.constant 128 : index
    %c0_14 = arith.constant 0 : index
    %37 = vector.load %arg2[%c128, %c0_14] : memref<152x128xf32, #tpu.memory_space<vmem>>, vector<16x2xf32>
    %c144 = arith.constant 144 : index
    %c0_15 = arith.constant 0 : index
    %38 = vector.load %arg2[%c144, %c0_15] : memref<152x128xf32, #tpu.memory_space<vmem>>, vector<1x2xf32>
    %cst_16 = arith.constant dense<0.000000e+00> : vector<8x2xf32>
    %39 = tpu.matmul %36, %37, %cst_16 {dimension_numbers = #tpu.dot_dimension_numbers<[1], [0], [0], [1], [0, 0, 1, 1], [], []>} : vector<8x16xf32>, vector<16x2xf32>, vector<8x2xf32> -> vector<8x2xf32>
    %40 = vector.broadcast %38 : vector<1x2xf32> to vector<8x2xf32>
    %41 = arith.addf %39, %40 : vector<8x2xf32>
    %42 = math.tanh %41 : vector<8x2xf32>
    %cst_17 = arith.constant 2.000000e+00 : f32
    %43 = vector.broadcast %cst_17 : f32 to vector<8x2xf32>
    %44 = arith.mulf %42, %43 : vector<8x2xf32>
    %cst_18 = arith.constant 0.000000e+00 : f32
    %45 = vector.broadcast %cst_18 : f32 to vector<8x2xf32>
    %46 = arith.maximumf %41, %45 : vector<8x2xf32>
    %47 = math.absf %41 : vector<8x2xf32>
    %cst_19 = arith.constant 0.000000e+00 : f32
    %48 = vector.broadcast %cst_19 : f32 to vector<8x2xf32>
    %49 = arith.subf %48, %47 : vector<8x2xf32>
    %50 = math.exp %49 : vector<8x2xf32>
    %51 = math.log1p %50 : vector<8x2xf32>
    %52 = arith.addf %46, %51 : vector<8x2xf32>
    %53 = tpu.iota {dimensions = array<i32: 1>} : vector<8x2xi32>
    %c0_i32 = arith.constant 0 : i32
    %54 = vector.broadcast %c0_i32 : i32 to vector<8x2xi32>
    %55 = arith.cmpi eq, %53, %54 : vector<8x2xi32>
    %56 = arith.select %55, %44, %52 : vector<8x2xi1>, vector<8x2xf32>
    %c0_20 = arith.constant 0 : index
    %c0_21 = arith.constant 0 : index
    %57 = vector.load %arg3[%c0_20, %c0_21] : memref<8x2xf32, #tpu.memory_space<vmem>>, vector<8x2xf32>
    tpu.vector_store %arg3[%c0_20, %c0_21], %56 {strides = array<i32>} : memref<8x2xf32, #tpu.memory_space<vmem>>, vector<8x2xf32>,
    return
  }
  func.func @transform_0(%arg0: i32) -> (i32, i32) {
    %c0_i32 = arith.constant 0 : i32
    %c0_i32_0 = arith.constant 0 : i32
    return %arg0, %c0_i32 : i32, i32
  }
  func.func @transform_1(%arg0: i32) -> (i32, i32) {
    %c0_i32 = arith.constant 0 : i32
    %c0_i32_0 = arith.constant 0 : i32
    %c0_i32_1 = arith.constant 0 : i32
    return %c0_i32, %c0_i32_0 : i32, i32
  }
  func.func @transform_2(%arg0: i32) -> (i32, i32) {
    %c0_i32 = arith.constant 0 : i32
    %c0_i32_0 = arith.constant 0 : i32
    return %arg0, %c0_i32 : i32, i32
  }
}

</mosaic_0001>

<bundles_post_ra>
// kernel: tpu_custom_call.1
= control target key start
LH: loop header
LB: loop body
LE: loop exit
PB: predicated region body
PF: predicated region fallthrough
CT: control target
= control target key end

     0   :  { %7 = vsyncpa [#allocation3], 0  ;;  %s451_s9 = smov [#allocation2]   ;;  %s503_s0 = inlined_call_operand.vmem [shape: f32[8,3], index: 0, kind: input, shape index: {}]   ;;  %s504_s1 = inlined_call_operand.hbm [shape: f32[152,128], index: 1, kind: input, shape index: {}]   ;;  %s505_s2 = inlined_call_operand.vmem [shape: f32[8,2], index: 2, kind: output, shape index: {}]  }
   0x1   :  { %s15_s10 = sshll.u32 %s451_s9, 4  ;;  %s16_s10 = int_to_ptr.vmem [resolvable:$true] %s15_s10 }
   0x2   :  { %s437_s11 = scalar_lea.vmem %s16_s10, 2432  ;;  %p442_p1 = scmp.lt.s32.totalorder %s16_s10, %s16_s10 }
   0x3   :  { %p438_p0 = scmp.ne.s32.totalorder %s16_s10, %s437_s11  ;;  %p443_p2 = scmp.lt.s32.totalorder %s437_s11, %s437_s11 }
   0x5   :  { %p444_p3 = por %p443_p2, %p442_p1 }
   0x7   :  { %p445_p4 = pnand %p444_p3, %p438_p0 }
   0x9   :  { %448 = shalt.err (!%p445_p4)
}
   0xa   :  { %s452_s12 = smov 128   ;;  %s453_s13 = smov 8  }
   0xb   :  { %21 = dma.hbm_to_vmem [thread:$0]  %s504_s1, 2432, %s16_s10, [#allocation3], %s452_s12, %s452_s12, %s453_s13  }
   0xc   :  { %449 = dma.done.wait [#allocation3], 2432  }
   0xd   :  { %450 = vsyncadd [#allocation3], 4294964864  ;;  %v454_v0 = vmov 0   ;;  %v455_v1 = vmov 2   ;;  %v456_v2 = vmov 0.0   ;;  %v25_v3 = vld [vmem:[%s503_s0] sm:$0xff]  ;;  %v336_v53 = vlaneseq }
   0xe   :  { %419 = vset.pattern.permute.xlu0 %v454_v0  ;;  %421 = vset.pattern.permute.xlu1 %v455_v1  ;;  %v73_v4 = vld [vmem:[#allocation2 + $0x48] sm:$0xff]  ;;  %v72_v5 = vld [vmem:[#allocation2 + $0x40] sm:$0xff]  ;;  %v71_v6 = vld [vmem:[#allocation2 + $0x38] sm:$0xff]  ;;  %v457_v7 = vmov 1   ;;  %vm458_vm0 = vmmov 0   ;;  %vm79_vm1 = vcmask 523264  }
   0xf   :  { %374 = vmatprep.subr.mxu0 %v456_v2  ;;  %393 = vmatprep.subr.mxu1 %v456_v2  ;;  %v70_v8 = vld [vmem:[#allocation2 + $0x30] sm:$0xff]  ;;  %v69_v9 = vld [vmem:[#allocation2 + $0x28] sm:$0xff]  ;;  %v68_v10 = vld [vmem:[#allocation2 + $0x20] sm:$0xff]  ;;  %vm163_vm2 = vcmask 261120   ;;  %vm245_vm3 = vcmask 130048   ;;  %v337_v56 = vand.u32 127, %v336_v53 }
  0x10   :  { %32 = vperm.xlu0 %419, %v25_v3   ;;  %51 = vperm.xlu1 %421, %v25_v3   ;;  %v67_v11 = vld [vmem:[#allocation2 + $0x18] sm:$0xff]  ;;  %v157_v12 = vld [vmem:[#allocation2 + $0x70] sm:$0xff]  ;;  %v347_v15 = vld [vmem:[#allocation2] ss:$0 sm:$0xff]  ;;  %vm340_vm6 = vcmask 15360  }
  0x11   :  { %375 = vmatpush3.msra.mxu0 %v73_v4  ;;  %390 = vmatprep.mubr.msk.f32.mxu0 %vm458_vm0, %v456_v2  ;;  %v66_v13 = vld [vmem:[#allocation2 + $0x10] sm:$0xff]  ;;  %v348_v16 = vld [vmem:[#allocation2 + $0x1] ss:$0 sm:$0xff]  ;;  %v349_v17 = vld [vmem:[#allocation2 + $0x2] ss:$0 sm:$0xff]  ;;  %vm338_vm5 = vcmp.eq.s32.totalorder %v337_v56, 0 }
  0x12   :  { %376 = vmatprep.subr.mxu0 %v456_v2  ;;  %401 = vmatprep.mubr.msk.f32.mxu1 %vm458_vm0, %v456_v2  ;;  %v350_v24 = vld [vmem:[#allocation2 + $0x8] ss:$0 sm:$0xff]  ;;  %v155_v29 = vld [vmem:[#allocation2 + $0x60] sm:$0xff]  ;;  %v154_v30 = vld [vmem:[#allocation2 + $0x58] sm:$0xff] }
  0x13   :  { %377 = vmatpush3.msra.mxu0 %v72_v5  ;;  %394 = vmatpush3.msra.mxu1 %v157_v12  ;;  %v156_v28 = vld [vmem:[#allocation2 + $0x68] sm:$0xff]  ;;  %v351_v31 = vld [vmem:[#allocation2 + $0x50] ss:$0 sm:$0xff]  ;;  %v238_v37 = vld [vmem:[#allocation2 + $0x80] sm:$0xff] }
  0x14   :  { %420 = vset.pattern.permute.xlu0 %v457_v7  ;;  %378 = vmatprep.subr.mxu0 %v456_v2  ;;  %v239_v36 = vld [vmem:[#allocation2 + $0x88] sm:$0xff]  ;;  %v353_v38 = vld [vmem:[#allocation2 + $0x78] ss:$0 sm:$0xff]  ;;  %v355_v43 = vld [vmem:[#allocation2 + $0x90] ss:$0 sm:$0xff] }
  0x15   :  { %41 = vperm.xlu0 %420, %v25_v3   ;;  %379 = vmatpush3.msra.mxu0 %v71_v6 }
  0x16   :  { %380 = vmatprep.subr.mxu0 %v456_v2  ;;  %395 = vmatprep.subr.mxu1 %v456_v2 }
  0x17   :  { %381 = vmatpush3.msra.mxu0 %v70_v8  ;;  %396 = vmatpush3.msra.mxu1 %v156_v28 }
  0x18   :  { %382 = vmatprep.subr.mxu0 %v456_v2  ;;  %397 = vmatprep.subr.mxu1 %v456_v2 }
  0x19   :  { %383 = vmatpush3.msra.mxu0 %v69_v9  ;;  %422 = vset.pattern.permute.xlu0 %v455_v1 }
  0x1a   :  { %384 = vmatprep.subr.mxu0 %v456_v2  ;;  %398 = vmatpush3.msra.mxu1 %v155_v29 }
  0x1b   :  { %385 = vmatpush3.msra.mxu0 %v68_v10  ;;  %399 = vmatprep.subr.mxu1 %v456_v2 }
  0x1c   :  { %386 = vmatprep.subr.mxu0 %v456_v2  ;;  %400 = vmatpush3.msra.mxu1 %v154_v30 }
  0x1d   :  { %387 = vmatpush3.msra.mxu0 %v67_v11  ;;  %404 = vmatprep.subr.mxu1 %v456_v2 }
  0x1e   :  { %388 = vmatprep.subr.mxu0 %v456_v2 }
  0x1f   :  { %389 = vmatpush3.msra.mxu0 %v66_v13 }
  0x8b   :  { %v33_v14 = vpop.permute.xlu0 %32  ;;  %v52_v18 = vpop.permute.xlu1 %51 }
  0x8c   :  { %v39_v20 = vmul.f32 %v347_v15, %v33_v14  ;;  %v58_v22 = vmul.f32 %v349_v17, %v52_v18 }
  0x90   :  { %v42_v19 = vpop.permute.xlu0 %41 }
  0x91   :  { %v48_v21 = vmul.f32 %v348_v16, %v42_v19 }
  0x93   :  { %v49_v23 = vadd.f32 %v48_v21, %v39_v20 }
  0x95   :  { %v59_v25 = vadd.f32 %v58_v22, %v49_v23 }
  0x97   :  { %v64_v26 = vadd.f32 %v350_v24, %v59_v25 }
  0x99   :  { %v65_v27 = vmax.f32 %v64_v26, 0.0 }
  0x9b   :  { %391 = vmatmul.mubr.msk.f32.vlgmr.msra.gmra.mxu0 %vm79_vm1, %v65_v27 }
 0x15b   :  { %v149_v32 = vpop.f32.mrf.mxu0 }
 0x15c   :  { %v150_v33 = vadd.f32 %v351_v31, %v149_v32 }
 0x15d   :  { %v392_v34 = vpop.f32.mrf.mxu0 }
 0x15e   :  { %v153_v35 = vmax.f32 %v150_v33, 0.0 }
 0x160   :  { %402 = vmatmul.mubr.msk.f32.vlgmr.msra.gmra.mxu1 %vm163_vm2, %v153_v35 }
 0x161   :  { %408 = vmatprep.mubr.msk.f32.mxu1 %vm458_vm0, %v456_v2  ;;  %405 = vmatpush3.msra.mxu1 %v239_v36 }
 0x162   :  { %406 = vmatprep.subr.mxu1 %v456_v2 }
 0x163   :  { %407 = vmatpush3.msra.mxu1 %v238_v37 }
 0x220   :  { %v233_v39 = vpop.f32.mrf.mxu1 }
 0x221   :  { %v234_v40 = vadd.f32 %v353_v38, %v233_v39 }
 0x222   :  { %v403_v41 = vpop.f32.mrf.mxu1 }
 0x223   :  { %v237_v42 = vmax.f32 %v234_v40, 0.0 }
 0x225   :  { %409 = vmatmul.mubr.msk.f32.vlgmr.msra.gmra.mxu1 %vm245_vm3, %v237_v42 }
 0x2e5   :  { %v315_v44 = vpop.f32.mrf.mxu1 }
 0x2e6   :  { %v316_v45 = vadd.f32 %v355_v43, %v315_v44 }
 0x2e7   :  { %v410_v46 = vpop.f32.mrf.mxu1 }
 0x2e8   :  { %v322_v47 = vand.u32 2147483647, %v316_v45  ;;  %v321_v61 = vmax.f32 %v316_v45, 0.0 }
 0x2ea   :  { %v323_v48 = vsub.f32 0.0, %v322_v47 }
 0x2ec   :  { %v324_v49 = vmul.f32 1.442695, %v323_v48 }
 0x2ee   :  { %423 = vpow2.f32 %v324_v49 }
 0x2fb   :  { %v424_v50 = vpop.eup %423 }
 0x2fc   :  { %v326_v51 = vadd.f32 1.0, %v424_v50  ;;  %v329_v52 = vmul.f32 -0.5, %v424_v50  ;;  %v332_v55 = vand.u32 2147483647, %v424_v50 }
 0x2fe   :  { %425 = vlog2.f32 %v326_v51  ;;  %v330_v54 = vadd.f32 1.0, %v329_v52  ;;  %vm333_vm4 = vcmp.lt.f32.partialorder %v332_v55, 0.0004427343 }
 0x2ff   :  { %427 = vtanh.f32 %v316_v45 }
 0x300   :  { %v331_v60 = vmul.f32 %v424_v50, %v330_v54 }
 0x30b   :  { %v426_v57 = vpop.eup %425 }
 0x30c   :  { %v428_v58 = vpop.eup %427  ;;  %v328_v59 = vmul.f32 0.6931472, %v426_v57 }
 0x30d   :  { %v320_v63 = vmul.f32 2.0, %v428_v58 }
 0x30e   :  { %v334_v62 = vsel %vm333_vm4, %v331_v60, %v328_v59 }
 0x30f   :  { %v335_v0 = vadd.f32 %v334_v62, %v321_v61 }
 0x311   :  { %v339_v1 = vsel %vm338_vm5, %v320_v63, %v335_v0 }
 0x312   :  { %341 = vst.msk [vmem:[%s505_s2] sm:$0xff] %vm340_vm6, %v339_v1 }
 0x313   :  { %346 = vsyncpa [#allocation3], 1 }

</bundles_post_ra>
